<compile_context>
chip_gen: v5e
topology: v5e:2x2
jax: 0.10.0
libtpu: 0.0.40
codegen_flags: <defaults>
</compile_context>

<pallas_src>
import functools

import jax
import jax.numpy as jnp
from jax import lax
from jax.experimental import pallas as pl
from jax.experimental.pallas import tpu as pltpu

_LANE = 128
_SUBLANE = 8


def _round_up(x, m):
    return (x + m - 1) // m * m


def _std_predictor_kernel(s_ref, a_ref, w1s_ref, w1a_ref, b1_ref, w2_ref, b2_ref,
                          out_ref, *, precision):
    # s_ref:  (TB, S)      a_ref:  (TB, A)
    # w1s_ref:(S, Hp)      w1a_ref:(A, Hp)     b1_ref:(1, Hp)
    # w2_ref: (Hp, So)     b2_ref: (1, So)     out_ref:(TB, So)   (So unpadded)
    s = s_ref[...]
    a = a_ref[...]
    # Fused "concat + Linear": cat(s, a) @ W1 == s @ W1[:S] + a @ W1[S:].
    h = jnp.dot(s, w1s_ref[...], preferred_element_type=jnp.float32,
                precision=precision)
    h = h + jnp.dot(a, w1a_ref[...], preferred_element_type=jnp.float32,
                    precision=precision)
    h = h + b1_ref[...]
    h = jnp.maximum(h, 0.0)                                   # ReLU (VPU)
    o = jnp.dot(h, w2_ref[...], preferred_element_type=jnp.float32,
                precision=precision) + b2_ref[...]
    out_ref[...] = jnp.clip(o, -20.0, 2.0).astype(out_ref.dtype)


def init_params(key, state_dim, action_dim, hidden_dim):
    """Deterministic synthetic init (same shapes as the PyTorch module).

    Weights are stored pre-transposed as (in_features, out_features)."""
    k1, k2, k3, k4 = jax.random.split(key, 4)
    in_dim = state_dim + action_dim
    w1 = jax.random.normal(k1, (in_dim, hidden_dim), jnp.float32) * (1.0 / jnp.sqrt(in_dim))
    b1 = jax.random.normal(k2, (1, hidden_dim), jnp.float32) * 0.01
    w2 = jax.random.normal(k3, (hidden_dim, state_dim), jnp.float32) * (1.0 / jnp.sqrt(hidden_dim))
    b2 = jax.random.normal(k4, (1, state_dim), jnp.float32) * 0.01
    return {"w1": w1, "b1": b1, "w2": w2, "b2": b2}


def prepare_params(params, state_dim):
    """Host-side, once: split W1 by input source and zero-pad only the HIDDEN
    dim up to a lane (128) multiple.  The output feature dim stays unpadded so
    the kernel can write the final (B, state_dim) result directly (no extra
    HBM slice pass).  Padding is exact: padded hidden columns are relu(0)=0 and
    the corresponding zero rows of W2 contribute nothing."""
    w1, b1, w2, b2 = params["w1"], params["b1"], params["w2"], params["b2"]
    in_dim, hidden = w1.shape
    s_out = w2.shape[1]
    hp = _round_up(hidden, _LANE)
    w1p = jnp.zeros((in_dim, hp), w1.dtype).at[:, :hidden].set(w1)
    b1p = jnp.zeros((1, hp), b1.dtype).at[:, :hidden].set(b1)
    w2p = jnp.zeros((hp, s_out), w2.dtype).at[:hidden, :].set(w2)
    return {
        "w1_s": w1p[:state_dim],      # (S, Hp)
        "w1_a": w1p[state_dim:],      # (A, Hp)
        "b1": b1p,                    # (1, Hp)
        "w2": w2p,                    # (Hp, So)
        "b2": b2,                     # (1, So) -- unpadded
    }


def _vmem_capacity_bytes():
    """Per-core VMEM capacity; conservative default if the query is unavailable."""
    try:
        return int(pltpu.get_tpu_info().vmem_capacity_bytes)
    except Exception:
        return 64 << 20   # v7x per-TC budget (the smallest of the family)


def _tile_bytes(rows, cols, itemsize=4):
    """Physical VMEM footprint of an f32 tile (lane/sublane padded)."""
    return _round_up(max(rows, 1), _SUBLANE) * _round_up(max(cols, 1), _LANE) * itemsize


def std_predictor_forward(state, action, prepped, *, batch_tile=None,
                          high_precision=False):
    """state: (B, state_dim), action: (B, action_dim) -> log_std: (B, state_dim)."""
    w1_s, w1_a = prepped["w1_s"], prepped["w1_a"]
    b1, w2, b2 = prepped["b1"], prepped["w2"], prepped["b2"]

    B, S = state.shape
    A = action.shape[1]
    Hp = w1_s.shape[1]
    So = w2.shape[1]          # unpadded output features (== state_dim)

    vmem_cap = _vmem_capacity_bytes()
    vmem_budget = int(vmem_cap * 0.8)   # leave ~20% headroom for Mosaic scratch

    # Mem-bound kernel: bigger batch tiles amortize per-step pipeline overhead.
    # Chips with 128 MiB VMEM (v5e/v6e) get a larger default than v7x (64 MiB/TC).
    if batch_tile is None:
        batch_tile = 2048 if vmem_cap >= (96 << 20) else 512

    # Weight/bias footprint for ONE buffer (lane/sublane padded).
    w_bytes_1buf = (_tile_bytes(S, Hp) + _tile_bytes(A, Hp) + _tile_bytes(1, Hp)
                    + _tile_bytes(Hp, So) + _tile_bytes(1, So))

    def vmem_need(tb, weight_bufs):
        io = 2 * (_tile_bytes(tb, S) + _tile_bytes(tb, A) + _tile_bytes(tb, So))
        hidden = _tile_bytes(tb, Hp)   # (TB, Hp) intermediate lives in VMEM too
        return io + weight_bufs * w_bytes_1buf + hidden

    def choose_tb(weight_bufs):
        if B <= _SUBLANE:
            return B   # single tile; block dim == full array dim is legal
        # Cap at cdiv(B, 2) so the "parallel" batch axis has >=2 grid steps and
        # can shard across v7x's two TensorCores (harmless on 1-TC chips).
        tb = min(_round_up(batch_tile, _SUBLANE),
                 _round_up(pl.cdiv(B, 2), _SUBLANE))
        tb = max(tb, _SUBLANE)
        # Graceful degradation: shrink the tile instead of spilling / failing.
        while tb > _SUBLANE and vmem_need(tb, weight_bufs) > vmem_budget:
            tb = max(_SUBLANE, _round_up(tb // 2, _SUBLANE))
        return tb

    precision = lax.Precision.HIGHEST if high_precision else None
    kernel = functools.partial(_std_predictor_kernel, precision=precision)

    flops = 2 * B * (S + A) * Hp + 2 * B * Hp * So
    bytes_accessed = (B * (S + A + So)) * 4 + w_bytes_1buf

    def build_and_call(single_buffer_weights):
        weight_bufs = 1 if single_buffer_weights else 2
        TB = choose_tb(weight_bufs)
        grid = (pl.cdiv(B, TB),)
        vmem_limit = int(min(max(2 * vmem_need(TB, weight_bufs), 16 << 20),
                             vmem_budget))

        batched = lambda cols: pl.BlockSpec((TB, cols), lambda i: (i, 0))
        if single_buffer_weights:
            # Constant index_map -> never re-fetched; request a single buffer so
            # weights are not silently double-buffered in VMEM.
            resident = lambda shape: pl.BlockSpec(shape, lambda i: (0, 0),
                                                  pipeline_mode=pl.Buffered(1))
        else:
            resident = lambda shape: pl.BlockSpec(shape, lambda i: (0, 0))

        return pl.pallas_call(
            kernel,
            out_shape=jax.ShapeDtypeStruct((B, So), jnp.float32),
            grid=grid,
            in_specs=[
                batched(S),                 # state
                batched(A),                 # action
                resident(w1_s.shape),       # weights stay VMEM-resident
                resident(w1_a.shape),
                resident(b1.shape),
                resident(w2.shape),
                resident(b2.shape),
            ],
            out_specs=batched(So),          # unpadded, lane-masked store; no slice pass
            compiler_params=pltpu.CompilerParams(
                dimension_semantics=("parallel",),
                vmem_limit_bytes=vmem_limit,
            ),
            cost_estimate=pl.CostEstimate(
                flops=flops, transcendentals=0, bytes_accessed=bytes_accessed),
        )(state, action, w1_s, w1_a, b1, w2, b2)

    try:
        return build_and_call(single_buffer_weights=True)
    except Exception:
        # pl.Buffered(1) not accepted by this JAX/Mosaic version — fall back to
        # the default (double-buffered) weight specs; everything else identical.
        return build_and_call(single_buffer_weights=False)


def _reference_forward(state, action, params):
    """Pure-JAX reference matching the PyTorch module exactly."""
    x = jnp.concatenate([state, action], axis=1)
    h = jnp.maximum(x @ params["w1"] + params["b1"], 0.0)
    return jnp.clip(h @ params["w2"] + params["b2"], -20.0, 2.0)


if __name__ == "__main__":
    state_dim, action_dim, hidden_dim = 8, 4, 32
    batch = 2

    key = jax.random.PRNGKey(0)
    kp, ks, ka = jax.random.split(key, 3)
    params = init_params(kp, state_dim, action_dim, hidden_dim)
    prepped = prepare_params(params, state_dim)

    state = jax.random.normal(ks, (batch, state_dim), jnp.float32)
    action = jax.random.normal(ka, (batch, action_dim), jnp.float32)

    out = std_predictor_forward(state, action, prepped)
    out = jax.block_until_ready(out)

    ref = _reference_forward(state, action, params)
    assert out.shape == (batch, state_dim), out.shape
    assert jnp.allclose(out, ref, atol=1e-4, rtol=1e-4), jnp.max(jnp.abs(out - ref))
    print("KERNEL_OK")
</pallas_src>

<mosaic_0001>
module attributes {stable_mosaic.version = 11 : i64} {
  func.func @_std_predictor_kernel(%arg0: i32, %arg1: memref<2x8xf32, #tpu.memory_space<vmem>>, %arg2: memref<2x4xf32, #tpu.memory_space<vmem>>, %arg3: memref<8x128xf32, #tpu.memory_space<vmem>>, %arg4: memref<4x128xf32, #tpu.memory_space<vmem>>, %arg5: memref<1x128xf32, #tpu.memory_space<vmem>>, %arg6: memref<128x8xf32, #tpu.memory_space<vmem>>, %arg7: memref<1x8xf32, #tpu.memory_space<vmem>>, %arg8: memref<2x8xf32, #tpu.memory_space<vmem>>) attributes {dimension_semantics = [#tpu.dimension_semantics<parallel>], iteration_bounds = array<i64: 1>, scalar_prefetch = 0 : i64, scratch_operands = 0 : i64, tpu.core_type = #tpu.core_type<tc>, window_params = [{transform_indices = @transform_0, window_bounds = array<i64: 2, 8>}, {transform_indices = @transform_1, window_bounds = array<i64: 2, 4>}, {pipeline_mode = #tpu.pipeline_mode<synchronous>, transform_indices = @transform_2, window_bounds = array<i64: 8, 128>}, {pipeline_mode = #tpu.pipeline_mode<synchronous>, transform_indices = @transform_3, window_bounds = array<i64: 4, 128>}, {pipeline_mode = #tpu.pipeline_mode<synchronous>, transform_indices = @transform_4, window_bounds = array<i64: 1, 128>}, {pipeline_mode = #tpu.pipeline_mode<synchronous>, transform_indices = @transform_5, window_bounds = array<i64: 128, 8>}, {pipeline_mode = #tpu.pipeline_mode<synchronous>, transform_indices = @transform_6, window_bounds = array<i64: 1, 8>}, {transform_indices = @transform_7, window_bounds = array<i64: 2, 8>}]} {
    %c0 = arith.constant 0 : index
    %c0_0 = arith.constant 0 : index
    %0 = vector.load %arg1[%c0, %c0_0] : memref<2x8xf32, #tpu.memory_space<vmem>>, vector<2x8xf32>
    %c0_1 = arith.constant 0 : index
    %c0_2 = arith.constant 0 : index
    %1 = vector.load %arg2[%c0_1, %c0_2] : memref<2x4xf32, #tpu.memory_space<vmem>>, vector<2x4xf32>
    %c0_3 = arith.constant 0 : index
    %c0_4 = arith.constant 0 : index
    %2 = vector.load %arg3[%c0_3, %c0_4] : memref<8x128xf32, #tpu.memory_space<vmem>>, vector<8x128xf32>
    %cst = arith.constant dense<0.000000e+00> : vector<2x128xf32>
    %3 = tpu.matmul %0, %2, %cst {dimension_numbers = #tpu.dot_dimension_numbers<[1], [0], [0], [1], [0, 0, 1, 1], [], []>} : vector<2x8xf32>, vector<8x128xf32>, vector<2x128xf32> -> vector<2x128xf32>
    %c0_5 = arith.constant 0 : index
    %c0_6 = arith.constant 0 : index
    %4 = vector.load %arg4[%c0_5, %c0_6] : memref<4x128xf32, #tpu.memory_space<vmem>>, vector<4x128xf32>
    %cst_7 = arith.constant dense<0.000000e+00> : vector<2x128xf32>
    %5 = tpu.matmul %1, %4, %cst_7 {dimension_numbers = #tpu.dot_dimension_numbers<[1], [0], [0], [1], [0, 0, 1, 1], [], []>} : vector<2x4xf32>, vector<4x128xf32>, vector<2x128xf32> -> vector<2x128xf32>
    %6 = arith.addf %3, %5 : vector<2x128xf32>
    %c0_8 = arith.constant 0 : index
    %c0_9 = arith.constant 0 : index
    %7 = vector.load %arg5[%c0_8, %c0_9] : memref<1x128xf32, #tpu.memory_space<vmem>>, vector<1x128xf32>
    %8 = vector.broadcast %7 : vector<1x128xf32> to vector<2x128xf32>
    %9 = arith.addf %6, %8 : vector<2x128xf32>
    %cst_10 = arith.constant 0.000000e+00 : f32
    %10 = vector.broadcast %cst_10 : f32 to vector<2x128xf32>
    %11 = arith.maximumf %9, %10 : vector<2x128xf32>
    %c0_11 = arith.constant 0 : index
    %c0_12 = arith.constant 0 : index
    %12 = vector.load %arg6[%c0_11, %c0_12] : memref<128x8xf32, #tpu.memory_space<vmem>>, vector<128x8xf32>
    %cst_13 = arith.constant dense<0.000000e+00> : vector<2x8xf32>
    %13 = tpu.matmul %11, %12, %cst_13 {dimension_numbers = #tpu.dot_dimension_numbers<[1], [0], [0], [1], [0, 0, 1, 1], [], []>} : vector<2x128xf32>, vector<128x8xf32>, vector<2x8xf32> -> vector<2x8xf32>
    %c0_14 = arith.constant 0 : index
    %c0_15 = arith.constant 0 : index
    %14 = vector.load %arg7[%c0_14, %c0_15] : memref<1x8xf32, #tpu.memory_space<vmem>>, vector<1x8xf32>
    %15 = vector.broadcast %14 : vector<1x8xf32> to vector<2x8xf32>
    %16 = arith.addf %13, %15 : vector<2x8xf32>
    %cst_16 = arith.constant -2.000000e+01 : f32
    %cst_17 = arith.constant 2.000000e+00 : f32
    %17 = vector.broadcast %cst_16 : f32 to vector<2x8xf32>
    %18 = arith.maximumf %17, %16 : vector<2x8xf32>
    %19 = vector.broadcast %cst_17 : f32 to vector<2x8xf32>
    %20 = arith.minimumf %19, %18 : vector<2x8xf32>
    %c0_18 = arith.constant 0 : index
    %c0_19 = arith.constant 0 : index
    %21 = vector.load %arg8[%c0_18, %c0_19] : memref<2x8xf32, #tpu.memory_space<vmem>>, vector<2x8xf32>
    tpu.vector_store %arg8[%c0_18, %c0_19], %20 {strides = array<i32>} : memref<2x8xf32, #tpu.memory_space<vmem>>, vector<2x8xf32>,
    return
  }
  func.func @transform_0(%arg0: i32) -> (i32, i32) {
    %c0_i32 = arith.constant 0 : i32
    %c0_i32_0 = arith.constant 0 : i32
    return %arg0, %c0_i32 : i32, i32
  }
  func.func @transform_1(%arg0: i32) -> (i32, i32) {
    %c0_i32 = arith.constant 0 : i32
    %c0_i32_0 = arith.constant 0 : i32
    return %arg0, %c0_i32 : i32, i32
  }
  func.func @transform_2(%arg0: i32) -> (i32, i32) {
    %c0_i32 = arith.constant 0 : i32
    %c0_i32_0 = arith.constant 0 : i32
    %c0_i32_1 = arith.constant 0 : i32
    return %c0_i32, %c0_i32_0 : i32, i32
  }
  func.func @transform_3(%arg0: i32) -> (i32, i32) {
    %c0_i32 = arith.constant 0 : i32
    %c0_i32_0 = arith.constant 0 : i32
    %c0_i32_1 = arith.constant 0 : i32
    return %c0_i32, %c0_i32_0 : i32, i32
  }
  func.func @transform_4(%arg0: i32) -> (i32, i32) {
    %c0_i32 = arith.constant 0 : i32
    %c0_i32_0 = arith.constant 0 : i32
    %c0_i32_1 = arith.constant 0 : i32
    return %c0_i32, %c0_i32_0 : i32, i32
  }
  func.func @transform_5(%arg0: i32) -> (i32, i32) {
    %c0_i32 = arith.constant 0 : i32
    %c0_i32_0 = arith.constant 0 : i32
    %c0_i32_1 = arith.constant 0 : i32
    return %c0_i32, %c0_i32_0 : i32, i32
  }
  func.func @transform_6(%arg0: i32) -> (i32, i32) {
    %c0_i32 = arith.constant 0 : i32
    %c0_i32_0 = arith.constant 0 : i32
    %c0_i32_1 = arith.constant 0 : i32
    return %c0_i32, %c0_i32_0 : i32, i32
  }
  func.func @transform_7(%arg0: i32) -> (i32, i32) {
    %c0_i32 = arith.constant 0 : i32
    %c0_i32_0 = arith.constant 0 : i32
    return %arg0, %c0_i32 : i32, i32
  }
}

module attributes {stable_mosaic.version = 11 : i64} {
  func.func @_std_predictor_kernel(%arg0: i32, %arg1: memref<2x8xf32, #tpu.memory_space<vmem>>, %arg2: memref<2x4xf32, #tpu.memory_space<vmem>>, %arg3: memref<8x128xf32, #tpu.memory_space<vmem>>, %arg4: memref<4x128xf32, #tpu.memory_space<vmem>>, %arg5: memref<1x128xf32, #tpu.memory_space<vmem>>, %arg6: memref<128x8xf32, #tpu.memory_space<vmem>>, %arg7: memref<1x8xf32, #tpu.memory_space<vmem>>, %arg8: memref<2x8xf32, #tpu.memory_space<vmem>>) attributes {dimension_semantics = [#tpu.dimension_semantics<parallel>], iteration_bounds = array<i64: 1>, scalar_prefetch = 0 : i64, scratch_operands = 0 : i64, tpu.core_type = #tpu.core_type<tc>, window_params = [{transform_indices = @transform_0, window_bounds = array<i64: 2, 8>}, {transform_indices = @transform_1, window_bounds = array<i64: 2, 4>}, {pipeline_mode = #tpu.pipeline_mode<synchronous>, transform_indices = @transform_2, window_bounds = array<i64: 8, 128>}, {pipeline_mode = #tpu.pipeline_mode<synchronous>, transform_indices = @transform_3, window_bounds = array<i64: 4, 128>}, {pipeline_mode = #tpu.pipeline_mode<synchronous>, transform_indices = @transform_4, window_bounds = array<i64: 1, 128>}, {pipeline_mode = #tpu.pipeline_mode<synchronous>, transform_indices = @transform_5, window_bounds = array<i64: 128, 8>}, {pipeline_mode = #tpu.pipeline_mode<synchronous>, transform_indices = @transform_6, window_bounds = array<i64: 1, 8>}, {transform_indices = @transform_7, window_bounds = array<i64: 2, 8>}]} {
    %c0 = arith.constant 0 : index
    %c0_0 = arith.constant 0 : index
    %0 = vector.load %arg1[%c0, %c0_0] : memref<2x8xf32, #tpu.memory_space<vmem>>, vector<2x8xf32>
    %c0_1 = arith.constant 0 : index
    %c0_2 = arith.constant 0 : index
    %1 = vector.load %arg2[%c0_1, %c0_2] : memref<2x4xf32, #tpu.memory_space<vmem>>, vector<2x4xf32>
    %c0_3 = arith.constant 0 : index
    %c0_4 = arith.constant 0 : index
    %2 = vector.load %arg3[%c0_3, %c0_4] : memref<8x128xf32, #tpu.memory_space<vmem>>, vector<8x128xf32>
    %cst = arith.constant dense<0.000000e+00> : vector<2x128xf32>
    %3 = tpu.matmul %0, %2, %cst {dimension_numbers = #tpu.dot_dimension_numbers<[1], [0], [0], [1], [0, 0, 1, 1], [], []>} : vector<2x8xf32>, vector<8x128xf32>, vector<2x128xf32> -> vector<2x128xf32>
    %c0_5 = arith.constant 0 : index
    %c0_6 = arith.constant 0 : index
    %4 = vector.load %arg4[%c0_5, %c0_6] : memref<4x128xf32, #tpu.memory_space<vmem>>, vector<4x128xf32>
    %cst_7 = arith.constant dense<0.000000e+00> : vector<2x128xf32>
    %5 = tpu.matmul %1, %4, %cst_7 {dimension_numbers = #tpu.dot_dimension_numbers<[1], [0], [0], [1], [0, 0, 1, 1], [], []>} : vector<2x4xf32>, vector<4x128xf32>, vector<2x128xf32> -> vector<2x128xf32>
    %6 = arith.addf %3, %5 : vector<2x128xf32>
    %c0_8 = arith.constant 0 : index
    %c0_9 = arith.constant 0 : index
    %7 = vector.load %arg5[%c0_8, %c0_9] : memref<1x128xf32, #tpu.memory_space<vmem>>, vector<1x128xf32>
    %8 = vector.broadcast %7 : vector<1x128xf32> to vector<2x128xf32>
    %9 = arith.addf %6, %8 : vector<2x128xf32>
    %cst_10 = arith.constant 0.000000e+00 : f32
    %10 = vector.broadcast %cst_10 : f32 to vector<2x128xf32>
    %11 = arith.maximumf %9, %10 : vector<2x128xf32>
    %c0_11 = arith.constant 0 : index
    %c0_12 = arith.constant 0 : index
    %12 = vector.load %arg6[%c0_11, %c0_12] : memref<128x8xf32, #tpu.memory_space<vmem>>, vector<128x8xf32>
    %cst_13 = arith.constant dense<0.000000e+00> : vector<2x8xf32>
    %13 = tpu.matmul %11, %12, %cst_13 {dimension_numbers = #tpu.dot_dimension_numbers<[1], [0], [0], [1], [0, 0, 1, 1], [], []>} : vector<2x128xf32>, vector<128x8xf32>, vector<2x8xf32> -> vector<2x8xf32>
    %c0_14 = arith.constant 0 : index
    %c0_15 = arith.constant 0 : index
    %14 = vector.load %arg7[%c0_14, %c0_15] : memref<1x8xf32, #tpu.memory_space<vmem>>, vector<1x8xf32>
    %15 = vector.broadcast %14 : vector<1x8xf32> to vector<2x8xf32>
    %16 = arith.addf %13, %15 : vector<2x8xf32>
    %cst_16 = arith.constant -2.000000e+01 : f32
    %cst_17 = arith.constant 2.000000e+00 : f32
    %17 = vector.broadcast %cst_16 : f32 to vector<2x8xf32>
    %18 = arith.maximumf %17, %16 : vector<2x8xf32>
    %19 = vector.broadcast %cst_17 : f32 to vector<2x8xf32>
    %20 = arith.minimumf %19, %18 : vector<2x8xf32>
    %c0_18 = arith.constant 0 : index
    %c0_19 = arith.constant 0 : index
    %21 = vector.load %arg8[%c0_18, %c0_19] : memref<2x8xf32, #tpu.memory_space<vmem>>, vector<2x8xf32>
    tpu.vector_store %arg8[%c0_18, %c0_19], %20 {strides = array<i32>} : memref<2x8xf32, #tpu.memory_space<vmem>>, vector<2x8xf32>,
    return
  }
  func.func @transform_0(%arg0: i32) -> (i32, i32) {
    %c0_i32 = arith.constant 0 : i32
    %c0_i32_0 = arith.constant 0 : i32
    return %arg0, %c0_i32 : i32, i32
  }
  func.func @transform_1(%arg0: i32) -> (i32, i32) {
    %c0_i32 = arith.constant 0 : i32
    %c0_i32_0 = arith.constant 0 : i32
    return %arg0, %c0_i32 : i32, i32
  }
  func.func @transform_2(%arg0: i32) -> (i32, i32) {
    %c0_i32 = arith.constant 0 : i32
    %c0_i32_0 = arith.constant 0 : i32
    %c0_i32_1 = arith.constant 0 : i32
    return %c0_i32, %c0_i32_0 : i32, i32
  }
  func.func @transform_3(%arg0: i32) -> (i32, i32) {
    %c0_i32 = arith.constant 0 : i32
    %c0_i32_0 = arith.constant 0 : i32
    %c0_i32_1 = arith.constant 0 : i32
    return %c0_i32, %c0_i32_0 : i32, i32
  }
  func.func @transform_4(%arg0: i32) -> (i32, i32) {
    %c0_i32 = arith.constant 0 : i32
    %c0_i32_0 = arith.constant 0 : i32
    %c0_i32_1 = arith.constant 0 : i32
    return %c0_i32, %c0_i32_0 : i32, i32
  }
  func.func @transform_5(%arg0: i32) -> (i32, i32) {
    %c0_i32 = arith.constant 0 : i32
    %c0_i32_0 = arith.constant 0 : i32
    %c0_i32_1 = arith.constant 0 : i32
    return %c0_i32, %c0_i32_0 : i32, i32
  }
  func.func @transform_6(%arg0: i32) -> (i32, i32) {
    %c0_i32 = arith.constant 0 : i32
    %c0_i32_0 = arith.constant 0 : i32
    %c0_i32_1 = arith.constant 0 : i32
    return %c0_i32, %c0_i32_0 : i32, i32
  }
  func.func @transform_7(%arg0: i32) -> (i32, i32) {
    %c0_i32 = arith.constant 0 : i32
    %c0_i32_0 = arith.constant 0 : i32
    return %arg0, %c0_i32 : i32, i32
  }
}

</mosaic_0001>

<bundles_post_ra>
// kernel: tpu_custom_call.1
= control target key start
LH: loop header
LB: loop body
LE: loop exit
PB: predicated region body
PF: predicated region fallthrough
CT: control target
= control target key end

     0   :  { %vm35_vm0 = vcmask 1043456   ;;  %vm31_vm1 = vcmask 31744   ;;  %vm59_vm2 = vcmask 64512   ;;  %s291_s0 = inlined_call_operand.vmem [shape: f32[2,8], index: 0, kind: input, shape index: {}]   ;;  %s292_s1 = inlined_call_operand.vmem [shape: f32[2,4], index: 1, kind: input, shape index: {}]   ;;  %s293_s2 = inlined_call_operand.vmem [shape: f32[8,128], index: 2, kind: input, shape index: {}]   ;;  %s294_s3 = inlined_call_operand.vmem [shape: f32[4,128], index: 3, kind: input, shape index: {}]   ;;  %s295_s4 = inlined_call_operand.vmem [shape: f32[1,128], index: 4, kind: input, shape index: {}]   ;;  %s296_s5 = inlined_call_operand.vmem [shape: f32[128,8], index: 5, kind: input, shape index: {}]   ;;  %s297_s6 = inlined_call_operand.vmem [shape: f32[1,8], index: 6, kind: input, shape index: {}]   ;;  %s298_s7 = inlined_call_operand.hbm [shape: f32[2,8], index: 7, kind: output, shape index: {}]  }
   0x1   :  { %v30_v0 = vld [vmem:[%s294_s3] sm:$0xf]  ;;  %v104_v4 = vld [vmem:[%s296_s5 + $0x78] sm:$0xff]  ;;  %v103_v5 = vld [vmem:[%s296_s5 + $0x70] sm:$0xff] }
   0x2   :  { %v29_v1 = vld [vmem:[%s293_s2] sm:$0xff]  ;;  %149 = vmatpush.msk.msra.mxu0 %vm35_vm0, %v30_v0  ;;  %109 = vmatpush.msra.mxu2 %v104_v4  ;;  %v102_v6 = vld [vmem:[%s296_s5 + $0x68] sm:$0xff] }
   0x3   :  { %v28_v2 = vld [vmem:[%s292_s1] sm:$0x3]  ;;  %78 = vmatpush.msra.mxu1 %v29_v1 }
   0x4   :  { %v27_v3 = vld [vmem:[%s291_s0] sm:$0x3]  ;;  %150 = vmatmul.msk.f32.vlgmr.msra.gmra.mxu0 %vm31_vm1, %v28_v2  ;;  %110 = vmatpush.msra.mxu2 %v103_v5 }
   0x5   :  { %151 = vmatmul.msk.f32.vlgmr.msra.gmra.mxu1 %vm59_vm2, %v27_v3  ;;  %v101_v7 = vld [vmem:[%s296_s5 + $0x60] sm:$0xff] }
   0x6   :  { %12 = vsyncpa [#allocation3], 0  ;;  %111 = vmatpush.msra.mxu2 %v102_v6  ;;  %v100_v8 = vld [vmem:[%s296_s5 + $0x58] sm:$0xff]  ;;  %v99_v9 = vld [vmem:[%s296_s5 + $0x50] sm:$0xff]  ;;  %s181_s14 = smov [#allocation2]   ;;  %s140_s17 = sshll.u32 %s298_s7, 4  ;;  %s141_s17 = int_to_ptr.hbm [resolvable:$true] %s140_s17 }
   0x7   :  { %v98_v10 = vld [vmem:[%s296_s5 + $0x48] sm:$0xff]  ;;  %v97_v11 = vld [vmem:[%s296_s5 + $0x40] sm:$0xff]  ;;  %v96_v12 = vld [vmem:[%s296_s5 + $0x38] sm:$0xff]  ;;  %vm131_vm3 = vcmask 58368  }
   0x8   :  { %112 = vmatpush.msra.mxu2 %v101_v7  ;;  %v95_v13 = vld [vmem:[%s296_s5 + $0x30] sm:$0xff]  ;;  %v94_v14 = vld [vmem:[%s296_s5 + $0x28] sm:$0xff]  ;;  %v93_v15 = vld [vmem:[%s296_s5 + $0x20] sm:$0xff] }
   0x9   :  { %v92_v16 = vld [vmem:[%s296_s5 + $0x18] sm:$0xff]  ;;  %v91_v17 = vld [vmem:[%s296_s5 + $0x10] sm:$0xff]  ;;  %v90_v18 = vld [vmem:[%s296_s5 + $0x8] sm:$0xff] }
   0xa   :  { %113 = vmatpush.msra.mxu2 %v100_v8  ;;  %v89_v19 = vld [vmem:[%s296_s5] sm:$0xff]  ;;  %s138_s5 = sshll.u32 %s181_s14, 4  ;;  %s139_s5 = int_to_ptr.vmem [resolvable:$true] %s138_s5 }
   0xb   :  { %v153_v20 = vld [vmem:[%s295_s4] ss:$0 sm:$0xff] }
   0xc   :  { %114 = vmatpush.msra.mxu2 %v99_v9  ;;  %v154_v26 = vld [vmem:[%s297_s6] ss:$0 sm:$0xff] }
   0xe   :  { %115 = vmatpush.msra.mxu2 %v98_v10 }
  0x10   :  { %116 = vmatpush.msra.mxu2 %v97_v11 }
  0x12   :  { %117 = vmatpush.msra.mxu2 %v96_v12 }
  0x14   :  { %118 = vmatpush.msra.mxu2 %v95_v13 }
  0x16   :  { %119 = vmatpush.msra.mxu2 %v94_v14 }
  0x18   :  { %120 = vmatpush.msra.mxu2 %v93_v15 }
  0x1a   :  { %121 = vmatpush.msra.mxu2 %v92_v16 }
  0x1c   :  { %122 = vmatpush.msra.mxu2 %v91_v17 }
  0x1e   :  { %123 = vmatpush.msra.mxu2 %v90_v18 }
  0x20   :  { %124 = vmatpush.msra.mxu2 %v89_v19 }
  0x81   :  { %v56_v21 = vpop.f32.mrf.mxu0 }
  0x82   :  { %v80_v22 = vpop.f32.mrf.mxu1 }
  0x83   :  { %v81_v23 = vadd.f32 %v80_v22, %v56_v21 }
  0x85   :  { %v87_v24 = vadd.f32 %v153_v20, %v81_v23 }
  0x87   :  { %v88_v25 = vmax.f32 %v87_v24, 0.0 }
  0x89   :  { %125 = vmatmul.f32.vlgmr.msra.gmra.mxu2 %v88_v25 }
 0x10c   :  { %v126_v27 = vpop.f32.mrf.mxu2 }
 0x10d   :  { %v127_v28 = vadd.f32 %v154_v26, %v126_v27 }
 0x10f   :  { %v129_v29 = vmax.f32 %v127_v28, -20.0 }
 0x111   :  { %v130_v30 = vmin.f32 %v129_v29, 2.0 }
 0x113   :  { %132 = vst.msk [vmem:[#allocation2] sm:$0x3] %vm131_vm3, %v130_v30 }
 0x114   :  { %143 = dma.vmem_to_hbm [thread:$0]  %s139_s5, 32, %s141_s17, [#allocation3]  }
 0x115   :  { %179 = dma.done.wait [#allocation3], 32  }
 0x116   :  { %180 = vsyncadd [#allocation3], 4294967264 }
 0x117   :  { %148 = vsyncpa [#allocation3], 1 }

// kernel: tpu_custom_call.1
= control target key start
LH: loop header
LB: loop body
LE: loop exit
PB: predicated region body
PF: predicated region fallthrough
CT: control target
= control target key end

     0   :  { %vm35_vm0 = vcmask 1043456   ;;  %vm31_vm1 = vcmask 31744   ;;  %vm59_vm2 = vcmask 64512   ;;  %s291_s0 = inlined_call_operand.vmem [shape: f32[2,8], index: 0, kind: input, shape index: {}]   ;;  %s292_s1 = inlined_call_operand.vmem [shape: f32[2,4], index: 1, kind: input, shape index: {}]   ;;  %s293_s2 = inlined_call_operand.vmem [shape: f32[8,128], index: 2, kind: input, shape index: {}]   ;;  %s294_s3 = inlined_call_operand.vmem [shape: f32[4,128], index: 3, kind: input, shape index: {}]   ;;  %s295_s4 = inlined_call_operand.vmem [shape: f32[1,128], index: 4, kind: input, shape index: {}]   ;;  %s296_s5 = inlined_call_operand.vmem [shape: f32[128,8], index: 5, kind: input, shape index: {}]   ;;  %s297_s6 = inlined_call_operand.vmem [shape: f32[1,8], index: 6, kind: input, shape index: {}]   ;;  %s298_s7 = inlined_call_operand.hbm [shape: f32[2,8], index: 7, kind: output, shape index: {}]  }
   0x1   :  { %v30_v0 = vld [vmem:[%s294_s3] sm:$0xf]  ;;  %v104_v4 = vld [vmem:[%s296_s5 + $0x78] sm:$0xff]  ;;  %v103_v5 = vld [vmem:[%s296_s5 + $0x70] sm:$0xff] }
   0x2   :  { %v29_v1 = vld [vmem:[%s293_s2] sm:$0xff]  ;;  %149 = vmatpush.msk.msra.mxu0 %vm35_vm0, %v30_v0  ;;  %109 = vmatpush.msra.mxu2 %v104_v4  ;;  %v102_v6 = vld [vmem:[%s296_s5 + $0x68] sm:$0xff] }
   0x3   :  { %v28_v2 = vld [vmem:[%s292_s1] sm:$0x3]  ;;  %78 = vmatpush.msra.mxu1 %v29_v1 }
   0x4   :  { %v27_v3 = vld [vmem:[%s291_s0] sm:$0x3]  ;;  %150 = vmatmul.msk.f32.vlgmr.msra.gmra.mxu0 %vm31_vm1, %v28_v2  ;;  %110 = vmatpush.msra.mxu2 %v103_v5 }
   0x5   :  { %151 = vmatmul.msk.f32.vlgmr.msra.gmra.mxu1 %vm59_vm2, %v27_v3  ;;  %v101_v7 = vld [vmem:[%s296_s5 + $0x60] sm:$0xff] }
   0x6   :  { %12 = vsyncpa [#allocation3], 0  ;;  %111 = vmatpush.msra.mxu2 %v102_v6  ;;  %v100_v8 = vld [vmem:[%s296_s5 + $0x58] sm:$0xff]  ;;  %v99_v9 = vld [vmem:[%s296_s5 + $0x50] sm:$0xff]  ;;  %s181_s14 = smov [#allocation2]   ;;  %s140_s17 = sshll.u32 %s298_s7, 4  ;;  %s141_s17 = int_to_ptr.hbm [resolvable:$true] %s140_s17 }
   0x7   :  { %v98_v10 = vld [vmem:[%s296_s5 + $0x48] sm:$0xff]  ;;  %v97_v11 = vld [vmem:[%s296_s5 + $0x40] sm:$0xff]  ;;  %v96_v12 = vld [vmem:[%s296_s5 + $0x38] sm:$0xff]  ;;  %vm131_vm3 = vcmask 58368  }
   0x8   :  { %112 = vmatpush.msra.mxu2 %v101_v7  ;;  %v95_v13 = vld [vmem:[%s296_s5 + $0x30] sm:$0xff]  ;;  %v94_v14 = vld [vmem:[%s296_s5 + $0x28] sm:$0xff]  ;;  %v93_v15 = vld [vmem:[%s296_s5 + $0x20] sm:$0xff] }
   0x9   :  { %v92_v16 = vld [vmem:[%s296_s5 + $0x18] sm:$0xff]  ;;  %v91_v17 = vld [vmem:[%s296_s5 + $0x10] sm:$0xff]  ;;  %v90_v18 = vld [vmem:[%s296_s5 + $0x8] sm:$0xff] }
   0xa   :  { %113 = vmatpush.msra.mxu2 %v100_v8  ;;  %v89_v19 = vld [vmem:[%s296_s5] sm:$0xff]  ;;  %s138_s5 = sshll.u32 %s181_s14, 4  ;;  %s139_s5 = int_to_ptr.vmem [resolvable:$true] %s138_s5 }
   0xb   :  { %v153_v20 = vld [vmem:[%s295_s4] ss:$0 sm:$0xff] }
   0xc   :  { %114 = vmatpush.msra.mxu2 %v99_v9  ;;  %v154_v26 = vld [vmem:[%s297_s6] ss:$0 sm:$0xff] }
   0xe   :  { %115 = vmatpush.msra.mxu2 %v98_v10 }
  0x10   :  { %116 = vmatpush.msra.mxu2 %v97_v11 }
  0x12   :  { %117 = vmatpush.msra.mxu2 %v96_v12 }
  0x14   :  { %118 = vmatpush.msra.mxu2 %v95_v13 }
  0x16   :  { %119 = vmatpush.msra.mxu2 %v94_v14 }
  0x18   :  { %120 = vmatpush.msra.mxu2 %v93_v15 }
  0x1a   :  { %121 = vmatpush.msra.mxu2 %v92_v16 }
  0x1c   :  { %122 = vmatpush.msra.mxu2 %v91_v17 }
  0x1e   :  { %123 = vmatpush.msra.mxu2 %v90_v18 }
  0x20   :  { %124 = vmatpush.msra.mxu2 %v89_v19 }
  0x81   :  { %v56_v21 = vpop.f32.mrf.mxu0 }
  0x82   :  { %v80_v22 = vpop.f32.mrf.mxu1 }
  0x83   :  { %v81_v23 = vadd.f32 %v80_v22, %v56_v21 }
  0x85   :  { %v87_v24 = vadd.f32 %v153_v20, %v81_v23 }
  0x87   :  { %v88_v25 = vmax.f32 %v87_v24, 0.0 }
  0x89   :  { %125 = vmatmul.f32.vlgmr.msra.gmra.mxu2 %v88_v25 }
 0x10c   :  { %v126_v27 = vpop.f32.mrf.mxu2 }
 0x10d   :  { %v127_v28 = vadd.f32 %v154_v26, %v126_v27 }
 0x10f   :  { %v129_v29 = vmax.f32 %v127_v28, -20.0 }
 0x111   :  { %v130_v30 = vmin.f32 %v129_v29, 2.0 }
 0x113   :  { %132 = vst.msk [vmem:[#allocation2] sm:$0x3] %vm131_vm3, %v130_v30 }
 0x114   :  { %143 = dma.vmem_to_hbm [thread:$0]  %s139_s5, 32, %s141_s17, [#allocation3]  }
 0x115   :  { %179 = dma.done.wait [#allocation3], 32  }
 0x116   :  { %180 = vsyncadd [#allocation3], 4294967264 }
 0x117   :  { %148 = vsyncpa [#allocation3], 1 }

</bundles_post_ra>
